<compile_context>
chip_gen: v5e
topology: v5e:2x2
jax: 0.10.0
libtpu: 0.0.40
codegen_flags: <defaults>
</compile_context>

<pallas_src>
import jax
import jax.numpy as jnp
from jax.experimental import pallas as pl
from jax.experimental.pallas import tpu as pltpu

_LANES = 128          # lane width of a vreg — lane-dense last dim
_TILE_ROWS = 1024     # 1024 x 128 x 4B = 0.5 MiB per f32 block


def _add_kernel(a_ref, b_ref, o_ref):
    # Single VPU elementwise add; exactly one store per vreg.
    o_ref[...] = a_ref[...] + b_ref[...]


@jax.jit
def pallas_add(a: jax.Array, b: jax.Array) -> jax.Array:
    assert a.shape == b.shape and a.dtype == b.dtype
    orig_shape = a.shape
    total = 1
    for d in orig_shape:
        total *= d

    # Flatten + pad to a multiple of 128 so the kernel sees a lane-dense
    # (rows, 128) slab. Padding is wrapper-side layout plumbing only.
    rows = pl.cdiv(total, _LANES)
    padded = rows * _LANES
    a_flat = a.reshape(-1)
    b_flat = b.reshape(-1)
    if padded != total:
        a_flat = jnp.pad(a_flat, (0, padded - total))
        b_flat = jnp.pad(b_flat, (0, padded - total))
    a2 = a_flat.reshape(rows, _LANES)
    b2 = b_flat.reshape(rows, _LANES)

    if rows <= _TILE_ROWS:
        # Tiny case: one block == full array (exempt from (8,128) divisibility).
        tile_rows = rows
        grid = (1,)
    else:
        tile_rows = _TILE_ROWS
        grid = (pl.cdiv(rows, tile_rows),)

    out2 = pl.pallas_call(
        _add_kernel,
        out_shape=jax.ShapeDtypeStruct((rows, _LANES), a.dtype),
        grid=grid,
        in_specs=[
            pl.BlockSpec((tile_rows, _LANES), lambda i: (i, 0)),
            pl.BlockSpec((tile_rows, _LANES), lambda i: (i, 0)),
        ],
        out_specs=pl.BlockSpec((tile_rows, _LANES), lambda i: (i, 0)),
        # Reuse input 0's buffer for the output — no extra output allocation.
        input_output_aliases={0: 0},
        compiler_params=pltpu.CompilerParams(
            dimension_semantics=("parallel",),
        ),
    )(a2, b2)

    out_flat = out2.reshape(-1)
    if padded != total:
        out_flat = out_flat[:total]
    return out_flat.reshape(orig_shape)


if __name__ == "__main__":
    key = jax.random.PRNGKey(0)
    k1, k2 = jax.random.split(key)
    # TestModule.forward(input1, input2) = input1 + input2 (no parameters).
    shape = (2, 4, 16, 16)
    x1 = jax.random.normal(k1, shape, dtype=jnp.float32)
    x2 = jax.random.normal(k2, shape, dtype=jnp.float32)

    out = pallas_add(x1, x2)
    jax.block_until_ready(out)

    ref = x1 + x2
    assert out.shape == ref.shape and out.dtype == ref.dtype
    assert jnp.allclose(out, ref), "Pallas add mismatch vs reference"
    print("KERNEL_OK")
</pallas_src>

<mosaic_0001>
module attributes {stable_mosaic.version = 11 : i64} {
  func.func @_add_kernel(%arg0: i32, %arg1: memref<16x128xf32, #tpu.memory_space<vmem>>, %arg2: memref<16x128xf32, #tpu.memory_space<vmem>>, %arg3: memref<16x128xf32, #tpu.memory_space<vmem>>) attributes {dimension_semantics = [#tpu.dimension_semantics<parallel>], iteration_bounds = array<i64: 1>, scalar_prefetch = 0 : i64, scratch_operands = 0 : i64, tpu.core_type = #tpu.core_type<tc>, window_params = [{transform_indices = @transform_0, window_bounds = array<i64: 16, 128>}, {transform_indices = @transform_1, window_bounds = array<i64: 16, 128>}, {transform_indices = @transform_2, window_bounds = array<i64: 16, 128>}]} {
    %c0 = arith.constant 0 : index
    %c0_0 = arith.constant 0 : index
    %0 = vector.load %arg1[%c0, %c0_0] : memref<16x128xf32, #tpu.memory_space<vmem>>, vector<16x128xf32>
    %c0_1 = arith.constant 0 : index
    %c0_2 = arith.constant 0 : index
    %1 = vector.load %arg2[%c0_1, %c0_2] : memref<16x128xf32, #tpu.memory_space<vmem>>, vector<16x128xf32>
    %2 = arith.addf %0, %1 : vector<16x128xf32>
    %c0_3 = arith.constant 0 : index
    %c0_4 = arith.constant 0 : index
    %3 = vector.load %arg3[%c0_3, %c0_4] : memref<16x128xf32, #tpu.memory_space<vmem>>, vector<16x128xf32>
    tpu.vector_store %arg3[%c0_3, %c0_4], %2 {strides = array<i32>} : memref<16x128xf32, #tpu.memory_space<vmem>>, vector<16x128xf32>,
    return
  }
  func.func @transform_0(%arg0: i32) -> (i32, i32) {
    %c0_i32 = arith.constant 0 : i32
    %c0_i32_0 = arith.constant 0 : i32
    return %arg0, %c0_i32 : i32, i32
  }
  func.func @transform_1(%arg0: i32) -> (i32, i32) {
    %c0_i32 = arith.constant 0 : i32
    %c0_i32_0 = arith.constant 0 : i32
    return %arg0, %c0_i32 : i32, i32
  }
  func.func @transform_2(%arg0: i32) -> (i32, i32) {
    %c0_i32 = arith.constant 0 : i32
    %c0_i32_0 = arith.constant 0 : i32
    return %arg0, %c0_i32 : i32, i32
  }
}

</mosaic_0001>

<bundles_post_ra>
// kernel: pallas_add.1
= control target key start
LH: loop header
LB: loop body
LE: loop exit
PB: predicated region body
PF: predicated region fallthrough
CT: control target
= control target key end

     0   :  { %s56_s0 = inlined_call_operand.vmem [shape: f32[16,128], index: 0, kind: input, shape index: {}, may-alias: {0,2}]   ;;  %s57_s1 = inlined_call_operand.vmem [shape: f32[16,128], index: 1, kind: input, shape index: {}]   ;;  %s58_s2 = inlined_call_operand.vmem [shape: f32[16,128], index: 2, kind: output, shape index: {}, may-alias: {0,2}]  }
   0x1   :  { %v11_v0 = vld [vmem:[%s56_s0] sm:$0xff]  ;;  %v12_v2 = vld [vmem:[%s56_s0 + $0x8] sm:$0xff] }
   0x2   :  { %v13_v1 = vld [vmem:[%s57_s1] sm:$0xff]  ;;  %v14_v4 = vld [vmem:[%s57_s1 + $0x8] sm:$0xff] }
   0x3   :  { %v15_v3 = vadd.f32 %v13_v1, %v11_v0  ;;  %v16_v5 = vadd.f32 %v14_v4, %v12_v2 }
   0x5   :  { %17 = vst [vmem:[%s58_s2] sm:$0xff] %v15_v3 }
   0x6   :  { %18 = vst [vmem:[%s58_s2 + $0x8] sm:$0xff] %v16_v5 }

</bundles_post_ra>
